<compile_context>
chip_gen: v6e
topology: v6e:2x2x1
jax: 0.10.0
libtpu: 0.0.40
codegen_flags: <defaults>
</compile_context>

<pallas_src>
import jax
import jax.numpy as jnp
from jax.experimental import pallas as pl
from jax.experimental.pallas import tpu as pltpu  # noqa: F401  (TPU-specific tuning hooks)


def _make_gru_kernel(T, B, I, H, h0_is_zero):
    H2, H3 = 2 * H, 3 * H

    def kernel(*refs):
        if h0_is_zero:
            x_ref, w_ref, u_ref, b_ref, y_ref = refs
            h0_ref = None
        else:
            x_ref, h0_ref, w_ref, u_ref, b_ref, y_ref = refs

        x2d = x_ref[...].astype(jnp.float32)                  # (T*B, I)
        w = w_ref[...].astype(jnp.float32)                    # (I, 3H)  r|z|n
        u = u_ref[...].astype(jnp.float32)                    # (H, 3H)  r|z|n
        b = b_ref[...].astype(jnp.float32)                    # (2, 3H)

        # One-shot input projection for all timesteps (off the serial path).
        # Row 0 of b carries the folded (b_ih + b_hh) r/z biases and the
        # input-side n bias.
        gi = jnp.dot(x2d, w, preferred_element_type=jnp.float32) + b[0:1]

        # Hidden-side bias row: [0 .. 0 | b_hh_n]; broadcast hoisted out of
        # the unrolled loop (JAX does not CSE broadcast_in_dim).
        b_h = jnp.broadcast_to(b[1:2], (B, H3))                # (B, 3H)

        hs = []
        if h0_is_zero:
            # Peel t == 0: h == 0  =>  h @ U == 0, and the r/z bias lanes of
            # b_h are zero, so the recurrent matmul is skipped entirely.
            s = gi[0:B]
            rz = jax.nn.sigmoid(s[:, :H2])
            r, z = rz[:, :H], rz[:, H:]
            n = jnp.tanh(s[:, H2:] + r * b_h[:, H2:])
            h = n - z * n                                      # (1 - z) * n, h == 0
            hs.append(h)
            t_start = 1
        else:
            h = h0_ref[...].astype(jnp.float32)                # (B, H)
            t_start = 0

        # Sequential recurrence, fully unrolled: ONE (B,H)@(H,3H) matmul,
        # one sigmoid launch over [0:2H] and one tanh over [2H:3H] per step.
        for t in range(t_start, T):
            lo = t * B
            gh = jnp.dot(h, u, preferred_element_type=jnp.float32) + b_h
            s = gi[lo:lo + B]
            rz = jax.nn.sigmoid(s[:, :H2] + gh[:, :H2])
            r, z = rz[:, :H], rz[:, H:]
            n = jnp.tanh(s[:, H2:] + r * gh[:, H2:])
            h = n + z * (h - n)                                # == (1-z)*n + z*h
            hs.append(h)

        # Single sublane/lane-dense (T*B, H) store, one clean writeback DMA.
        y_ref[...] = jnp.concatenate(hs, axis=0).astype(y_ref.dtype)

    return kernel


def pack_gru_params(w_ih, w_hh, b_ih, b_hh):
    """One-time parameter packing (call OUTSIDE the jit'd forward).
       PyTorch shapes: w_ih (3H, I), w_hh (3H, H), b_ih (3H,), b_hh (3H,)."""
    H = w_hh.shape[1]
    w_packed = w_ih.T                                          # (I, 3H), r|z|n columns
    u_packed = w_hh.T                                          # (H, 3H)
    b_top = jnp.concatenate([b_ih[:H] + b_hh[:H],              # r (folded)
                             b_ih[H:2 * H] + b_hh[H:2 * H],    # z (folded)
                             b_ih[2 * H:]])                    # n, input side
    b_hid = jnp.concatenate([jnp.zeros((2 * H,), b_hh.dtype),
                             b_hh[2 * H:]])                    # n, hidden side (inside r*(.))
    bias = jnp.stack([b_top, b_hid], axis=0)                   # (2, 3H)
    return w_packed, u_packed, bias


def gru_forward_packed(x, w_packed, u_packed, bias, h0=None):
    """x: (T, B, I) seq-major; h0: (1, B, H) or None (== zeros, the
       AutoRegressor.init_hidden case).  Returns (y, h_n)."""
    T, B, I = x.shape
    H = u_packed.shape[0]
    h0_is_zero = h0 is None

    kernel = _make_gru_kernel(T, B, I, H, h0_is_zero)
    operands = [x.reshape(T * B, I)]
    if not h0_is_zero:
        operands.append(h0[0])                                 # (B, H)
    operands += [w_packed, u_packed, bias]

    y2d = pl.pallas_call(
        kernel,
        out_shape=jax.ShapeDtypeStruct((T * B, H), x.dtype),
    )(*operands)

    y = y2d.reshape(T, B, H)
    h_n = y[-1:]                                               # (1, B, H)
    return y, h_n


def gru_reference(x, h0, w_ih, w_hh, b_ih, b_hh):
    """Pure-JAX reference (PyTorch GRU semantics) for verification."""
    H = h0.shape[-1]

    def step(h, x_t):
        gi = x_t @ w_ih.T + b_ih
        gh = h @ w_hh.T + b_hh
        i_r, i_z, i_n = gi[:, :H], gi[:, H:2 * H], gi[:, 2 * H:]
        h_r, h_z, h_n = gh[:, :H], gh[:, H:2 * H], gh[:, 2 * H:]
        r = jax.nn.sigmoid(i_r + h_r)
        z = jax.nn.sigmoid(i_z + h_z)
        n = jnp.tanh(i_n + r * h_n)
        h_new = (1.0 - z) * n + z * h
        return h_new, h_new

    h_last, ys = jax.lax.scan(step, h0[0], x)
    return ys, h_last[None]


if __name__ == "__main__":
    # Small shapes consistent with the module: seq=8, batch=2,
    # n_latents=4 (GRU input_size), hidden_size=32.
    T, B, I, H = 8, 2, 4, 32

    key = jax.random.PRNGKey(0)
    kx, kh, k1, k2, k3, k4 = jax.random.split(key, 6)

    # kaiming_normal_(mode='fan_out', relu): std = sqrt(2 / (3H)).
    w_std = (2.0 / (3 * H)) ** 0.5
    w_ih = w_std * jax.random.normal(k1, (3 * H, I), jnp.float32)
    w_hh = w_std * jax.random.normal(k2, (3 * H, H), jnp.float32)
    # Biases keep PyTorch's default uniform(-1/sqrt(H), 1/sqrt(H)) init.
    b_bound = 1.0 / (H ** 0.5)
    b_ih = jax.random.uniform(k3, (3 * H,), jnp.float32, -b_bound, b_bound)
    b_hh = jax.random.uniform(k4, (3 * H,), jnp.float32, -b_bound, b_bound)

    x = jax.random.normal(kx, (T, B, I), jnp.float32)

    # One-time packing, outside the jit'd forward path.
    w_packed, u_packed, bias = pack_gru_params(w_ih, w_hh, b_ih, b_hh)
    fwd = jax.jit(gru_forward_packed)

    # Case 1: AutoRegressor.init_hidden -> zeros (peeled first step, 4 operands).
    y, h_n = fwd(x, w_packed, u_packed, bias, None)
    y = jax.block_until_ready(y)
    h_n = jax.block_until_ready(h_n)
    h0_zero = jnp.zeros((1, B, H), jnp.float32)
    y_ref, h_ref = gru_reference(x, h0_zero, w_ih, w_hh, b_ih, b_hh)
    assert jnp.allclose(y, y_ref, atol=1e-5, rtol=1e-5), "output mismatch (zero h0)"
    assert jnp.allclose(h_n, h_ref, atol=1e-5, rtol=1e-5), "hidden mismatch (zero h0)"

    # Case 2: arbitrary nonzero h0 (general path, 5 operands).
    h0 = jax.random.normal(kh, (1, B, H), jnp.float32)
    y2, h_n2 = fwd(x, w_packed, u_packed, bias, h0)
    y2 = jax.block_until_ready(y2)
    h_n2 = jax.block_until_ready(h_n2)
    y2_ref, h2_ref = gru_reference(x, h0, w_ih, w_hh, b_ih, b_hh)
    assert jnp.allclose(y2, y2_ref, atol=1e-5, rtol=1e-5), "output mismatch (nonzero h0)"
    assert jnp.allclose(h_n2, h2_ref, atol=1e-5, rtol=1e-5), "hidden mismatch (nonzero h0)"

    print("KERNEL_OK")
</pallas_src>

<mosaic_0001>
module attributes {stable_mosaic.version = 11 : i64} {
  func.func @kernel(%arg0: memref<16x4xf32, #tpu.memory_space<vmem>>, %arg1: memref<4x96xf32, #tpu.memory_space<vmem>>, %arg2: memref<32x96xf32, #tpu.memory_space<vmem>>, %arg3: memref<2x96xf32, #tpu.memory_space<vmem>>, %arg4: memref<16x32xf32, #tpu.memory_space<vmem>>) attributes {dimension_semantics = [], scalar_prefetch = 0 : i64, scratch_operands = 0 : i64, tpu.core_type = #tpu.core_type<tc>} {
    %c0 = arith.constant 0 : index
    %c0_0 = arith.constant 0 : index
    %0 = vector.load %arg0[%c0, %c0_0] : memref<16x4xf32, #tpu.memory_space<vmem>>, vector<16x4xf32>
    %c0_1 = arith.constant 0 : index
    %c0_2 = arith.constant 0 : index
    %1 = vector.load %arg1[%c0_1, %c0_2] : memref<4x96xf32, #tpu.memory_space<vmem>>, vector<4x96xf32>
    %c0_3 = arith.constant 0 : index
    %c0_4 = arith.constant 0 : index
    %2 = vector.load %arg2[%c0_3, %c0_4] : memref<32x96xf32, #tpu.memory_space<vmem>>, vector<32x96xf32>
    %c0_5 = arith.constant 0 : index
    %c0_6 = arith.constant 0 : index
    %3 = vector.load %arg3[%c0_5, %c0_6] : memref<2x96xf32, #tpu.memory_space<vmem>>, vector<2x96xf32>
    %cst = arith.constant dense<0.000000e+00> : vector<16x96xf32>
    %4 = tpu.matmul %0, %1, %cst {dimension_numbers = #tpu.dot_dimension_numbers<[1], [0], [0], [1], [0, 0, 1, 1], [], []>} : vector<16x4xf32>, vector<4x96xf32>, vector<16x96xf32> -> vector<16x96xf32>
    %5 = vector.extract_strided_slice %3 {offsets = [0, 0], sizes = [1, 96], strides = [1, 1]} : vector<2x96xf32> to vector<1x96xf32>
    %6 = vector.broadcast %5 : vector<1x96xf32> to vector<16x96xf32>
    %7 = arith.addf %4, %6 : vector<16x96xf32>
    %8 = vector.extract_strided_slice %3 {offsets = [1, 0], sizes = [1, 96], strides = [1, 1]} : vector<2x96xf32> to vector<1x96xf32>
    %9 = vector.shape_cast %8 : vector<1x96xf32> to vector<1x96xf32>
    %10 = vector.broadcast %9 : vector<1x96xf32> to vector<2x96xf32>
    %11 = vector.extract_strided_slice %7 {offsets = [0, 0], sizes = [2, 96], strides = [1, 1]} : vector<16x96xf32> to vector<2x96xf32>
    %12 = vector.extract_strided_slice %11 {offsets = [0, 0], sizes = [2, 64], strides = [1, 1]} : vector<2x96xf32> to vector<2x64xf32>
    %13 = arith.negf %12 : vector<2x64xf32>
    %14 = math.exp %13 : vector<2x64xf32>
    %cst_7 = arith.constant 1.000000e+00 : f32
    %15 = vector.broadcast %cst_7 : f32 to vector<2x64xf32>
    %16 = arith.addf %15, %14 : vector<2x64xf32>
    %17 = arith.divf %15, %16 : vector<2x64xf32>
    %18 = vector.extract_strided_slice %17 {offsets = [0, 0], sizes = [2, 32], strides = [1, 1]} : vector<2x64xf32> to vector<2x32xf32>
    %19 = vector.extract_strided_slice %17 {offsets = [0, 32], sizes = [2, 32], strides = [1, 1]} : vector<2x64xf32> to vector<2x32xf32>
    %20 = vector.extract_strided_slice %11 {offsets = [0, 64], sizes = [2, 32], strides = [1, 1]} : vector<2x96xf32> to vector<2x32xf32>
    %21 = vector.extract_strided_slice %10 {offsets = [0, 64], sizes = [2, 32], strides = [1, 1]} : vector<2x96xf32> to vector<2x32xf32>
    %22 = arith.mulf %18, %21 : vector<2x32xf32>
    %23 = arith.addf %20, %22 : vector<2x32xf32>
    %24 = math.tanh %23 : vector<2x32xf32>
    %25 = arith.mulf %19, %24 : vector<2x32xf32>
    %26 = arith.subf %24, %25 : vector<2x32xf32>
    %cst_8 = arith.constant dense<0.000000e+00> : vector<2x96xf32>
    %27 = tpu.matmul %26, %2, %cst_8 {dimension_numbers = #tpu.dot_dimension_numbers<[1], [0], [0], [1], [0, 0, 1, 1], [], []>} : vector<2x32xf32>, vector<32x96xf32>, vector<2x96xf32> -> vector<2x96xf32>
    %28 = arith.addf %27, %10 : vector<2x96xf32>
    %29 = vector.extract_strided_slice %7 {offsets = [2, 0], sizes = [2, 96], strides = [1, 1]} : vector<16x96xf32> to vector<2x96xf32>
    %30 = vector.extract_strided_slice %29 {offsets = [0, 0], sizes = [2, 64], strides = [1, 1]} : vector<2x96xf32> to vector<2x64xf32>
    %31 = vector.extract_strided_slice %28 {offsets = [0, 0], sizes = [2, 64], strides = [1, 1]} : vector<2x96xf32> to vector<2x64xf32>
    %32 = arith.addf %30, %31 : vector<2x64xf32>
    %33 = arith.negf %32 : vector<2x64xf32>
    %34 = math.exp %33 : vector<2x64xf32>
    %cst_9 = arith.constant 1.000000e+00 : f32
    %35 = vector.broadcast %cst_9 : f32 to vector<2x64xf32>
    %36 = arith.addf %35, %34 : vector<2x64xf32>
    %37 = arith.divf %35, %36 : vector<2x64xf32>
    %38 = vector.extract_strided_slice %37 {offsets = [0, 0], sizes = [2, 32], strides = [1, 1]} : vector<2x64xf32> to vector<2x32xf32>
    %39 = vector.extract_strided_slice %37 {offsets = [0, 32], sizes = [2, 32], strides = [1, 1]} : vector<2x64xf32> to vector<2x32xf32>
    %40 = vector.extract_strided_slice %29 {offsets = [0, 64], sizes = [2, 32], strides = [1, 1]} : vector<2x96xf32> to vector<2x32xf32>
    %41 = vector.extract_strided_slice %28 {offsets = [0, 64], sizes = [2, 32], strides = [1, 1]} : vector<2x96xf32> to vector<2x32xf32>
    %42 = arith.mulf %38, %41 : vector<2x32xf32>
    %43 = arith.addf %40, %42 : vector<2x32xf32>
    %44 = math.tanh %43 : vector<2x32xf32>
    %45 = arith.subf %26, %44 : vector<2x32xf32>
    %46 = arith.mulf %39, %45 : vector<2x32xf32>
    %47 = arith.addf %44, %46 : vector<2x32xf32>
    %cst_10 = arith.constant dense<0.000000e+00> : vector<2x96xf32>
    %48 = tpu.matmul %47, %2, %cst_10 {dimension_numbers = #tpu.dot_dimension_numbers<[1], [0], [0], [1], [0, 0, 1, 1], [], []>} : vector<2x32xf32>, vector<32x96xf32>, vector<2x96xf32> -> vector<2x96xf32>
    %49 = arith.addf %48, %10 : vector<2x96xf32>
    %50 = vector.extract_strided_slice %7 {offsets = [4, 0], sizes = [2, 96], strides = [1, 1]} : vector<16x96xf32> to vector<2x96xf32>
    %51 = vector.extract_strided_slice %50 {offsets = [0, 0], sizes = [2, 64], strides = [1, 1]} : vector<2x96xf32> to vector<2x64xf32>
    %52 = vector.extract_strided_slice %49 {offsets = [0, 0], sizes = [2, 64], strides = [1, 1]} : vector<2x96xf32> to vector<2x64xf32>
    %53 = arith.addf %51, %52 : vector<2x64xf32>
    %54 = arith.negf %53 : vector<2x64xf32>
    %55 = math.exp %54 : vector<2x64xf32>
    %cst_11 = arith.constant 1.000000e+00 : f32
    %56 = vector.broadcast %cst_11 : f32 to vector<2x64xf32>
    %57 = arith.addf %56, %55 : vector<2x64xf32>
    %58 = arith.divf %56, %57 : vector<2x64xf32>
    %59 = vector.extract_strided_slice %58 {offsets = [0, 0], sizes = [2, 32], strides = [1, 1]} : vector<2x64xf32> to vector<2x32xf32>
    %60 = vector.extract_strided_slice %58 {offsets = [0, 32], sizes = [2, 32], strides = [1, 1]} : vector<2x64xf32> to vector<2x32xf32>
    %61 = vector.extract_strided_slice %50 {offsets = [0, 64], sizes = [2, 32], strides = [1, 1]} : vector<2x96xf32> to vector<2x32xf32>
    %62 = vector.extract_strided_slice %49 {offsets = [0, 64], sizes = [2, 32], strides = [1, 1]} : vector<2x96xf32> to vector<2x32xf32>
    %63 = arith.mulf %59, %62 : vector<2x32xf32>
    %64 = arith.addf %61, %63 : vector<2x32xf32>
    %65 = math.tanh %64 : vector<2x32xf32>
    %66 = arith.subf %47, %65 : vector<2x32xf32>
    %67 = arith.mulf %60, %66 : vector<2x32xf32>
    %68 = arith.addf %65, %67 : vector<2x32xf32>
    %cst_12 = arith.constant dense<0.000000e+00> : vector<2x96xf32>
    %69 = tpu.matmul %68, %2, %cst_12 {dimension_numbers = #tpu.dot_dimension_numbers<[1], [0], [0], [1], [0, 0, 1, 1], [], []>} : vector<2x32xf32>, vector<32x96xf32>, vector<2x96xf32> -> vector<2x96xf32>
    %70 = arith.addf %69, %10 : vector<2x96xf32>
    %71 = vector.extract_strided_slice %7 {offsets = [6, 0], sizes = [2, 96], strides = [1, 1]} : vector<16x96xf32> to vector<2x96xf32>
    %72 = vector.extract_strided_slice %71 {offsets = [0, 0], sizes = [2, 64], strides = [1, 1]} : vector<2x96xf32> to vector<2x64xf32>
    %73 = vector.extract_strided_slice %70 {offsets = [0, 0], sizes = [2, 64], strides = [1, 1]} : vector<2x96xf32> to vector<2x64xf32>
    %74 = arith.addf %72, %73 : vector<2x64xf32>
    %75 = arith.negf %74 : vector<2x64xf32>
    %76 = math.exp %75 : vector<2x64xf32>
    %cst_13 = arith.constant 1.000000e+00 : f32
    %77 = vector.broadcast %cst_13 : f32 to vector<2x64xf32>
    %78 = arith.addf %77, %76 : vector<2x64xf32>
    %79 = arith.divf %77, %78 : vector<2x64xf32>
    %80 = vector.extract_strided_slice %79 {offsets = [0, 0], sizes = [2, 32], strides = [1, 1]} : vector<2x64xf32> to vector<2x32xf32>
    %81 = vector.extract_strided_slice %79 {offsets = [0, 32], sizes = [2, 32], strides = [1, 1]} : vector<2x64xf32> to vector<2x32xf32>
    %82 = vector.extract_strided_slice %71 {offsets = [0, 64], sizes = [2, 32], strides = [1, 1]} : vector<2x96xf32> to vector<2x32xf32>
    %83 = vector.extract_strided_slice %70 {offsets = [0, 64], sizes = [2, 32], strides = [1, 1]} : vector<2x96xf32> to vector<2x32xf32>
    %84 = arith.mulf %80, %83 : vector<2x32xf32>
    %85 = arith.addf %82, %84 : vector<2x32xf32>
    %86 = math.tanh %85 : vector<2x32xf32>
    %87 = arith.subf %68, %86 : vector<2x32xf32>
    %88 = arith.mulf %81, %87 : vector<2x32xf32>
    %89 = arith.addf %86, %88 : vector<2x32xf32>
    %cst_14 = arith.constant dense<0.000000e+00> : vector<2x96xf32>
    %90 = tpu.matmul %89, %2, %cst_14 {dimension_numbers = #tpu.dot_dimension_numbers<[1], [0], [0], [1], [0, 0, 1, 1], [], []>} : vector<2x32xf32>, vector<32x96xf32>, vector<2x96xf32> -> vector<2x96xf32>
    %91 = arith.addf %90, %10 : vector<2x96xf32>
    %92 = vector.extract_strided_slice %7 {offsets = [8, 0], sizes = [2, 96], strides = [1, 1]} : vector<16x96xf32> to vector<2x96xf32>
    %93 = vector.extract_strided_slice %92 {offsets = [0, 0], sizes = [2, 64], strides = [1, 1]} : vector<2x96xf32> to vector<2x64xf32>
    %94 = vector.extract_strided_slice %91 {offsets = [0, 0], sizes = [2, 64], strides = [1, 1]} : vector<2x96xf32> to vector<2x64xf32>
    %95 = arith.addf %93, %94 : vector<2x64xf32>
    %96 = arith.negf %95 : vector<2x64xf32>
    %97 = math.exp %96 : vector<2x64xf32>
    %cst_15 = arith.constant 1.000000e+00 : f32
    %98 = vector.broadcast %cst_15 : f32 to vector<2x64xf32>
    %99 = arith.addf %98, %97 : vector<2x64xf32>
    %100 = arith.divf %98, %99 : vector<2x64xf32>
    %101 = vector.extract_strided_slice %100 {offsets = [0, 0], sizes = [2, 32], strides = [1, 1]} : vector<2x64xf32> to vector<2x32xf32>
    %102 = vector.extract_strided_slice %100 {offsets = [0, 32], sizes = [2, 32], strides = [1, 1]} : vector<2x64xf32> to vector<2x32xf32>
    %103 = vector.extract_strided_slice %92 {offsets = [0, 64], sizes = [2, 32], strides = [1, 1]} : vector<2x96xf32> to vector<2x32xf32>
    %104 = vector.extract_strided_slice %91 {offsets = [0, 64], sizes = [2, 32], strides = [1, 1]} : vector<2x96xf32> to vector<2x32xf32>
    %105 = arith.mulf %101, %104 : vector<2x32xf32>
    %106 = arith.addf %103, %105 : vector<2x32xf32>
    %107 = math.tanh %106 : vector<2x32xf32>
    %108 = arith.subf %89, %107 : vector<2x32xf32>
    %109 = arith.mulf %102, %108 : vector<2x32xf32>
    %110 = arith.addf %107, %109 : vector<2x32xf32>
    %cst_16 = arith.constant dense<0.000000e+00> : vector<2x96xf32>
    %111 = tpu.matmul %110, %2, %cst_16 {dimension_numbers = #tpu.dot_dimension_numbers<[1], [0], [0], [1], [0, 0, 1, 1], [], []>} : vector<2x32xf32>, vector<32x96xf32>, vector<2x96xf32> -> vector<2x96xf32>
    %112 = arith.addf %111, %10 : vector<2x96xf32>
    %113 = vector.extract_strided_slice %7 {offsets = [10, 0], sizes = [2, 96], strides = [1, 1]} : vector<16x96xf32> to vector<2x96xf32>
    %114 = vector.extract_strided_slice %113 {offsets = [0, 0], sizes = [2, 64], strides = [1, 1]} : vector<2x96xf32> to vector<2x64xf32>
    %115 = vector.extract_strided_slice %112 {offsets = [0, 0], sizes = [2, 64], strides = [1, 1]} : vector<2x96xf32> to vector<2x64xf32>
    %116 = arith.addf %114, %115 : vector<2x64xf32>
    %117 = arith.negf %116 : vector<2x64xf32>
    %118 = math.exp %117 : vector<2x64xf32>
    %cst_17 = arith.constant 1.000000e+00 : f32
    %119 = vector.broadcast %cst_17 : f32 to vector<2x64xf32>
    %120 = arith.addf %119, %118 : vector<2x64xf32>
    %121 = arith.divf %119, %120 : vector<2x64xf32>
    %122 = vector.extract_strided_slice %121 {offsets = [0, 0], sizes = [2, 32], strides = [1, 1]} : vector<2x64xf32> to vector<2x32xf32>
    %123 = vector.extract_strided_slice %121 {offsets = [0, 32], sizes = [2, 32], strides = [1, 1]} : vector<2x64xf32> to vector<2x32xf32>
    %124 = vector.extract_strided_slice %113 {offsets = [0, 64], sizes = [2, 32], strides = [1, 1]} : vector<2x96xf32> to vector<2x32xf32>
    %125 = vector.extract_strided_slice %112 {offsets = [0, 64], sizes = [2, 32], strides = [1, 1]} : vector<2x96xf32> to vector<2x32xf32>
    %126 = arith.mulf %122, %125 : vector<2x32xf32>
    %127 = arith.addf %124, %126 : vector<2x32xf32>
    %128 = math.tanh %127 : vector<2x32xf32>
    %129 = arith.subf %110, %128 : vector<2x32xf32>
    %130 = arith.mulf %123, %129 : vector<2x32xf32>
    %131 = arith.addf %128, %130 : vector<2x32xf32>
    %cst_18 = arith.constant dense<0.000000e+00> : vector<2x96xf32>
    %132 = tpu.matmul %131, %2, %cst_18 {dimension_numbers = #tpu.dot_dimension_numbers<[1], [0], [0], [1], [0, 0, 1, 1], [], []>} : vector<2x32xf32>, vector<32x96xf32>, vector<2x96xf32> -> vector<2x96xf32>
    %133 = arith.addf %132, %10 : vector<2x96xf32>
    %134 = vector.extract_strided_slice %7 {offsets = [12, 0], sizes = [2, 96], strides = [1, 1]} : vector<16x96xf32> to vector<2x96xf32>
    %135 = vector.extract_strided_slice %134 {offsets = [0, 0], sizes = [2, 64], strides = [1, 1]} : vector<2x96xf32> to vector<2x64xf32>
    %136 = vector.extract_strided_slice %133 {offsets = [0, 0], sizes = [2, 64], strides = [1, 1]} : vector<2x96xf32> to vector<2x64xf32>
    %137 = arith.addf %135, %136 : vector<2x64xf32>
    %138 = arith.negf %137 : vector<2x64xf32>
    %139 = math.exp %138 : vector<2x64xf32>
    %cst_19 = arith.constant 1.000000e+00 : f32
    %140 = vector.broadcast %cst_19 : f32 to vector<2x64xf32>
    %141 = arith.addf %140, %139 : vector<2x64xf32>
    %142 = arith.divf %140, %141 : vector<2x64xf32>
    %143 = vector.extract_strided_slice %142 {offsets = [0, 0], sizes = [2, 32], strides = [1, 1]} : vector<2x64xf32> to vector<2x32xf32>
    %144 = vector.extract_strided_slice %142 {offsets = [0, 32], sizes = [2, 32], strides = [1, 1]} : vector<2x64xf32> to vector<2x32xf32>
    %145 = vector.extract_strided_slice %134 {offsets = [0, 64], sizes = [2, 32], strides = [1, 1]} : vector<2x96xf32> to vector<2x32xf32>
    %146 = vector.extract_strided_slice %133 {offsets = [0, 64], sizes = [2, 32], strides = [1, 1]} : vector<2x96xf32> to vector<2x32xf32>
    %147 = arith.mulf %143, %146 : vector<2x32xf32>
    %148 = arith.addf %145, %147 : vector<2x32xf32>
    %149 = math.tanh %148 : vector<2x32xf32>
    %150 = arith.subf %131, %149 : vector<2x32xf32>
    %151 = arith.mulf %144, %150 : vector<2x32xf32>
    %152 = arith.addf %149, %151 : vector<2x32xf32>
    %cst_20 = arith.constant dense<0.000000e+00> : vector<2x96xf32>
    %153 = tpu.matmul %152, %2, %cst_20 {dimension_numbers = #tpu.dot_dimension_numbers<[1], [0], [0], [1], [0, 0, 1, 1], [], []>} : vector<2x32xf32>, vector<32x96xf32>, vector<2x96xf32> -> vector<2x96xf32>
    %154 = arith.addf %153, %10 : vector<2x96xf32>
    %155 = vector.extract_strided_slice %7 {offsets = [14, 0], sizes = [2, 96], strides = [1, 1]} : vector<16x96xf32> to vector<2x96xf32>
    %156 = vector.extract_strided_slice %155 {offsets = [0, 0], sizes = [2, 64], strides = [1, 1]} : vector<2x96xf32> to vector<2x64xf32>
    %157 = vector.extract_strided_slice %154 {offsets = [0, 0], sizes = [2, 64], strides = [1, 1]} : vector<2x96xf32> to vector<2x64xf32>
    %158 = arith.addf %156, %157 : vector<2x64xf32>
    %159 = arith.negf %158 : vector<2x64xf32>
    %160 = math.exp %159 : vector<2x64xf32>
    %cst_21 = arith.constant 1.000000e+00 : f32
    %161 = vector.broadcast %cst_21 : f32 to vector<2x64xf32>
    %162 = arith.addf %161, %160 : vector<2x64xf32>
    %163 = arith.divf %161, %162 : vector<2x64xf32>
    %164 = vector.extract_strided_slice %163 {offsets = [0, 0], sizes = [2, 32], strides = [1, 1]} : vector<2x64xf32> to vector<2x32xf32>
    %165 = vector.extract_strided_slice %163 {offsets = [0, 32], sizes = [2, 32], strides = [1, 1]} : vector<2x64xf32> to vector<2x32xf32>
    %166 = vector.extract_strided_slice %155 {offsets = [0, 64], sizes = [2, 32], strides = [1, 1]} : vector<2x96xf32> to vector<2x32xf32>
    %167 = vector.extract_strided_slice %154 {offsets = [0, 64], sizes = [2, 32], strides = [1, 1]} : vector<2x96xf32> to vector<2x32xf32>
    %168 = arith.mulf %164, %167 : vector<2x32xf32>
    %169 = arith.addf %166, %168 : vector<2x32xf32>
    %170 = math.tanh %169 : vector<2x32xf32>
    %171 = arith.subf %152, %170 : vector<2x32xf32>
    %172 = arith.mulf %165, %171 : vector<2x32xf32>
    %173 = arith.addf %170, %172 : vector<2x32xf32>
    %174 = tpu.concatenate %26, %47, %68, %89, %110, %131, %152, %173 in 0 : vector<2x32xf32>, vector<2x32xf32>, vector<2x32xf32>, vector<2x32xf32>, vector<2x32xf32>, vector<2x32xf32>, vector<2x32xf32>, vector<2x32xf32> -> vector<16x32xf32>
    %c0_22 = arith.constant 0 : index
    %c0_23 = arith.constant 0 : index
    %175 = vector.load %arg4[%c0_22, %c0_23] : memref<16x32xf32, #tpu.memory_space<vmem>>, vector<16x32xf32>
    tpu.vector_store %arg4[%c0_22, %c0_23], %174 {strides = array<i32>} : memref<16x32xf32, #tpu.memory_space<vmem>>, vector<16x32xf32>,
    return
  }
}

</mosaic_0001>

<bundles_post_ra>
// kernel: gru_forward_packed.1
= control target key start
LH: loop header
LB: loop body
LE: loop exit
PB: predicated region body
PF: predicated region fallthrough
CT: control target
= control target key end

     0   :  { %9 = vsyncpa [#allocation3], 0  ;;  %s1173_s15 = smov [#allocation2]   ;;  %s1419_s0 = inlined_call_operand.vmem [shape: f32[16,4], index: 0, kind: input, shape index: {}]   ;;  %s1420_s1 = inlined_call_operand.vmem [shape: f32[4,96], index: 1, kind: input, shape index: {}]   ;;  %s1421_s2 = inlined_call_operand.hbm [shape: f32[32,96], index: 2, kind: input, shape index: {}]   ;;  %s1422_s3 = inlined_call_operand.vmem [shape: f32[2,96], index: 3, kind: input, shape index: {}]   ;;  %s1423_s4 = inlined_call_operand.vmem [shape: f32[16,32], index: 4, kind: output, shape index: {}]  }
   0x1   :  { %s19_s16 = sshll.u32 %s1173_s15, 4  ;;  %s20_s16 = int_to_ptr.vmem [resolvable:$true] %s19_s16 }
   0x2   :  { %s1159_s17 = scalar_lea.vmem %s20_s16, 512  ;;  %p1164_p1 = scmp.lt.s32.totalorder %s20_s16, %s20_s16 }
   0x3   :  { %p1160_p0 = scmp.ne.s32.totalorder %s20_s16, %s1159_s17  ;;  %p1165_p2 = scmp.lt.s32.totalorder %s1159_s17, %s1159_s17 }
   0x5   :  { %p1166_p3 = por %p1165_p2, %p1164_p1 }
   0x7   :  { %p1167_p4 = pnand %p1166_p3, %p1160_p0 }
   0x9   :  { %1170 = shalt.err (!%p1167_p4)
}
   0xa   :  { %s1174_s18 = smov 128   ;;  %s1175_s19 = smov 8  }
   0xb   :  { %25 = dma.hbm_to_vmem [thread:$0]  %s1421_s2, 512, %s20_s16, [#allocation3], %s1174_s18, %s1174_s18, %s1175_s19  }
   0xc   :  { %1171 = dma.done.wait [#allocation3], 512  }
   0xd   :  { %1172 = vsyncadd [#allocation3], 4294966784  ;;  %v39_v0 = vlaneseq  ;;  %vm50_vm0 = vcmask 1043456   ;;  %vm43_vm1 = vcmask 31744   ;;  %v33_v4 = vld [vmem:[%s1420_s1] sm:$0xf] }
   0xe   :  { %v31_v5 = vld [vmem:[%s1419_s0] sm:$0xff]  ;;  %v32_v6 = vld [vmem:[%s1419_s0 + $0x8] sm:$0xff]  ;;  %1013 = vmatprep.subr.msk.mxu0 %vm50_vm0, %v33_v4  ;;  %s1176_s1 = smov 64   ;;  %s1177_s0 = smov 96   ;;  %v1235_v23 = vld [vmem:[#allocation2 + $0x18] sm:$0xff]  ;;  %v1178_v24 = vmov 0.0  }
   0xf   :  { %v40_v1 = vshrl.u32 %v39_v0, 7  ;;  %1015 = vmatprep.mubr.msk.f32.mxu0 %vm43_vm1, %v31_v5  ;;  %v38_v7 = vld [vmem:[%s1422_s3] sm:$0x3]  ;;  %1014 = vmatpush3.msk.msra.mxu0 %vm50_vm0, %v33_v4  ;;  %v1238_v25 = vld [vmem:[#allocation2 + $0x10] sm:$0xff]  ;;  %vm1179_vm2 = vmmov 0   ;;  %v1245_v26 = vld [vmem:[#allocation2 + $0x8] sm:$0xff] }
  0x10   :  { %1016 = vmatmul.mubr.msk.f32.vlgmr.msra.gmra.mxu0 %vm43_vm1, %v32_v6  ;;  %1018 = vmatprep.subr.mxu1 %v1178_v24  ;;  %v1251_v27 = vld [vmem:[#allocation2] sm:$0xff]  ;;  %s1180_s3 = smov 32   ;;  %vm163_vm3 = vcmask 261120   ;;  %vm934_vm4 = vcmask 1041408   ;;  %vm937_vm5 = vcmask 1045504  }
  0x11   :  { %v131_v2 = vsub.s32 1, %v40_v1  ;;  %v41_v3 = vsub.s32 0, %v40_v1  ;;  %1026 = vmatprep.mubr.msk.f32.mxu1 %vm1179_vm2, %v1178_v24  ;;  %1019 = vmatpush3.msra.mxu1 %v1235_v23 }
  0x12   :  { %1029 = vmatprep.subr.mxu0 %v1178_v24  ;;  %1020 = vmatprep.subr.mxu1 %v1178_v24 }
  0x13   :  { %v1223_v8 = vrot.slane %v38_v7, %v131_v2  ;;  %v42_v9 = vrot.slane %v38_v7, %v41_v3  ;;  %1030 = vmatpush3.msra.mxu0 %v1235_v23  ;;  %1021 = vmatpush3.msra.mxu1 %v1238_v25 }
  0x14   :  { %1031 = vmatprep.subr.mxu0 %v1178_v24  ;;  %1022 = vmatprep.subr.mxu1 %v1178_v24 }
  0x15   :  { %140 = vrot.lane.b32.xlu0 %v1223_v8, %s1176_s1  ;;  %1032 = vmatpush3.msra.mxu0 %v1238_v25 }
  0x16   :  { %1023 = vmatpush3.msra.mxu1 %v1245_v26  ;;  %1033 = vmatprep.subr.mxu0 %v1178_v24 }
  0x17   :  { %1024 = vmatprep.subr.mxu1 %v1178_v24  ;;  %1034 = vmatpush3.msra.mxu0 %v1245_v26 }
  0x18   :  { %1025 = vmatpush3.msra.mxu1 %v1251_v27  ;;  %1035 = vmatprep.subr.mxu0 %v1178_v24 }
  0x19   :  { %1036 = vmatpush3.msra.mxu0 %v1251_v27  ;;  %1037 = vmatprep.mubr.msk.f32.mxu0 %vm1179_vm2, %v1178_v24 }
  0x1a   :  { %1040 = vmatprep.subr.mxu1 %v1178_v24  ;;  %1051 = vmatprep.subr.mxu0 %v1178_v24 }
  0x87   :  { %v141_v17 = vpop.permute.xlu0 %140 }
  0xd0   :  { %v1017_v10 = vpop.f32.mrf.mxu0 }
  0xd1   :  { %v1227_v11 = vadd.f32 %v1017_v10, %v42_v9 }
  0xd2   :  { %v120_v12 = vpop.f32.mrf.mxu0 }
  0xd3   :  { %v1229_v13 = vadd.f32 %v120_v12, %v42_v9 }
  0xd5   :  { %v960_v14 = vmul.f32 -1.442695, %v1229_v13 }
  0xd7   :  { %1103 = vpow2.f32 %v960_v14 }
  0xe4   :  { %v1104_v15 = vpop.eup %1103 }
  0xe5   :  { %v136_v16 = vadd.f32 1.0, %v1104_v15 }
  0xe7   :  { %1105 = vrcp.f32 %v136_v16 }
  0xf4   :  { %v1106_v18 = vpop.eup %1105 }
  0xf5   :  { %v143_v19 = vmul.f32 %v1106_v18, %v141_v17 }
  0xf7   :  { %145 = vrot.lane.b32.xlu0 %v143_v19, %s1176_s1 }
 0x169   :  { %v146_v20 = vpop.permute.xlu0 %145 }
 0x16a   :  { %v148_v21 = vadd.f32 %v146_v20, %v1229_v13 }
 0x16c   :  { %1107 = vtanh.f32 %v148_v21 }
 0x179   :  { %v1108_v22 = vpop.eup %1107 }
 0x17a   :  { %151 = vrot.lane.b32.xlu1 %v1108_v22, %s1177_s0 }
 0x1ec   :  { %v152_v28 = vpop.permute.xlu1 %151 }
 0x1ed   :  { %v154_v29 = vmul.f32 %v1106_v18, %v152_v28 }
 0x1ef   :  { %156 = vrot.lane.b32.xlu1 %v154_v29, %s1180_s3 }
 0x261   :  { %v157_v30 = vpop.permute.xlu1 %156 }
 0x262   :  { %v1266_v31 = vsub.f32 %v1108_v22, %v157_v30 }
 0x264   :  { %161 = vrot.lane.b32.xlu0 %v1266_v31, %s1176_s1 }
 0x2d6   :  { %v162_v32 = vpop.permute.xlu0 %161 }
 0x2d7   :  { %1027 = vmatmul.mubr.msk.f32.vlgmr.msra.gmra.mxu1 %vm163_vm3, %v162_v32 }
 0x2d8   :  { %1041 = vmatpush3.msra.mxu1 %v1235_v23  ;;  %1048 = vmatprep.mubr.msk.f32.mxu1 %vm1179_vm2, %v1178_v24 }
 0x2d9   :  { %1042 = vmatprep.subr.mxu1 %v1178_v24 }
 0x2da   :  { %1043 = vmatpush3.msra.mxu1 %v1238_v25 }
 0x2db   :  { %1044 = vmatprep.subr.mxu1 %v1178_v24 }
 0x2dc   :  { %1045 = vmatpush3.msra.mxu1 %v1245_v26 }
 0x2dd   :  { %1046 = vmatprep.subr.mxu1 %v1178_v24 }
 0x2de   :  { %1047 = vmatpush3.msra.mxu1 %v1251_v27 }
 0x2df   :  { %1062 = vmatprep.subr.mxu1 %v1178_v24 }
 0x397   :  { %v232_v33 = vpop.f32.mrf.mxu1 }
 0x398   :  { %v233_v34 = vadd.f32 %v232_v33, %v1223_v8 }
 0x399   :  { %v1028_v35 = vpop.f32.mrf.mxu1 }
 0x39a   :  { %v237_v36 = vrot.slane %v233_v34, 6 }
 0x39c   :  { %246 = vrot.lane.b32.xlu1 %v237_v36, %s1176_s1  ;;  %v239_v37 = vadd.f32 %v237_v36, %v1229_v13 }
 0x39e   :  { %v962_v38 = vmul.f32 -1.442695, %v239_v37 }
 0x3a0   :  { %1109 = vpow2.f32 %v962_v38 }
 0x3ad   :  { %v1110_v39 = vpop.eup %1109 }
 0x3ae   :  { %v243_v40 = vadd.f32 1.0, %v1110_v39 }
 0x3b0   :  { %1111 = vrcp.f32 %v243_v40 }
 0x3bd   :  { %v1112_v41 = vpop.eup %1111 }
 0x40e   :  { %v247_v42 = vpop.permute.xlu1 %246 }
 0x40f   :  { %v249_v43 = vmul.f32 %v1112_v41, %v247_v42 }
 0x411   :  { %251 = vrot.lane.b32.xlu0 %v249_v43, %s1176_s1 }
 0x483   :  { %v252_v44 = vpop.permute.xlu0 %251 }
 0x484   :  { %v254_v45 = vadd.f32 %v252_v44, %v1229_v13 }
 0x486   :  { %1113 = vtanh.f32 %v254_v45 }
 0x493   :  { %v1114_v46 = vpop.eup %1113 }
 0x494   :  { %v257_v47 = vrot.slane %v1114_v46, 2 }
 0x496   :  { %v259_v48 = vsub.f32 %v1266_v31, %v257_v47 }
 0x498   :  { %v261_v49 = vrot.slane %v259_v48, 6 }
 0x49a   :  { %262 = vrot.lane.b32.xlu1 %v261_v49, %s1177_s0 }
 0x50c   :  { %v263_v50 = vpop.permute.xlu1 %262 }
 0x50d   :  { %v265_v51 = vmul.f32 %v1112_v41, %v263_v50 }
 0x50f   :  { %267 = vrot.lane.b32.xlu0 %v265_v51, %s1180_s3 }
 0x581   :  { %v268_v52 = vpop.permute.xlu0 %267 }
 0x582   :  { %v1289_v53 = vadd.f32 %v1114_v46, %v268_v52 }
 0x584   :  { %v272_v54 = vrot.slane %v1289_v53, 2 }
 0x586   :  { %273 = vrot.lane.b32.xlu1 %v272_v54, %s1176_s1 }
 0x5f8   :  { %v274_v55 = vpop.permute.xlu1 %273 }
 0x5f9   :  { %1038 = vmatmul.mubr.msk.f32.vlgmr.msra.gmra.mxu0 %vm163_vm3, %v274_v55 }
 0x5fa   :  { %1052 = vmatpush3.msra.mxu0 %v1235_v23  ;;  %1059 = vmatprep.mubr.msk.f32.mxu0 %vm1179_vm2, %v1178_v24 }
 0x5fb   :  { %1053 = vmatprep.subr.mxu0 %v1178_v24 }
 0x5fc   :  { %1054 = vmatpush3.msra.mxu0 %v1238_v25 }
 0x5fd   :  { %1055 = vmatprep.subr.mxu0 %v1178_v24 }
 0x5fe   :  { %1056 = vmatpush3.msra.mxu0 %v1245_v26 }
 0x5ff   :  { %1057 = vmatprep.subr.mxu0 %v1178_v24 }
 0x600   :  { %1058 = vmatpush3.msra.mxu0 %v1251_v27 }
 0x601   :  { %1073 = vmatprep.subr.mxu0 %v1178_v24 }
 0x6b9   :  { %v343_v56 = vpop.f32.mrf.mxu0 }
 0x6ba   :  { %v344_v57 = vadd.f32 %v343_v56, %v1223_v8 }
 0x6bb   :  { %v1039_v58 = vpop.f32.mrf.mxu0 }
 0x6bc   :  { %v348_v59 = vrot.slane %v344_v57, 4 }
 0x6be   :  { %357 = vrot.lane.b32.xlu0 %v348_v59, %s1176_s1  ;;  %v350_v60 = vadd.f32 %v348_v59, %v1229_v13 }
 0x6c0   :  { %v964_v61 = vmul.f32 -1.442695, %v350_v60 }
 0x6c2   :  { %1115 = vpow2.f32 %v964_v61 }
 0x6cf   :  { %v1116_v62 = vpop.eup %1115 }
 0x6d0   :  { %v354_v63 = vadd.f32 1.0, %v1116_v62 }
 0x6d2   :  { %1117 = vrcp.f32 %v354_v63 }
 0x6df   :  { %v1118_v0 = vpop.eup %1117 }
 0x730   :  { %v358_v1 = vpop.permute.xlu0 %357 }
 0x731   :  { %v360_v2 = vmul.f32 %v1118_v0, %v358_v1 }
 0x733   :  { %362 = vrot.lane.b32.xlu1 %v360_v2, %s1176_s1 }
 0x7a5   :  { %v363_v3 = vpop.permute.xlu1 %362 }
 0x7a6   :  { %v365_v4 = vadd.f32 %v363_v3, %v1229_v13 }
 0x7a8   :  { %1119 = vtanh.f32 %v365_v4 }
 0x7b5   :  { %v1120_v5 = vpop.eup %1119 }
 0x7b6   :  { %v368_v6 = vrot.slane %v1120_v5, 2 }
 0x7b8   :  { %v370_v7 = vsub.f32 %v1289_v53, %v368_v6 }
 0x7ba   :  { %v372_v9 = vrot.slane %v370_v7, 6 }
 0x7bc   :  { %373 = vrot.lane.b32.xlu0 %v372_v9, %s1177_s0 }
 0x82e   :  { %v374_v10 = vpop.permute.xlu0 %373 }
 0x82f   :  { %v376_v12 = vmul.f32 %v1118_v0, %v374_v10 }
 0x831   :  { %378 = vrot.lane.b32.xlu1 %v376_v12, %s1180_s3 }
 0x8a3   :  { %v379_v14 = vpop.permute.xlu1 %378 }
 0x8a4   :  { %v1312_v15 = vadd.f32 %v1120_v5, %v379_v14 }
 0x8a6   :  { %v383_v16 = vrot.slane %v1312_v15, 4 }
 0x8a8   :  { %384 = vrot.lane.b32.xlu0 %v383_v16, %s1176_s1 }
 0x91a   :  { %v385_v17 = vpop.permute.xlu0 %384 }
 0x91b   :  { %1049 = vmatmul.mubr.msk.f32.vlgmr.msra.gmra.mxu1 %vm163_vm3, %v385_v17 }
 0x91c   :  { %1063 = vmatpush3.msra.mxu1 %v1235_v23  ;;  %1070 = vmatprep.mubr.msk.f32.mxu1 %vm1179_vm2, %v1178_v24 }
 0x91d   :  { %1064 = vmatprep.subr.mxu1 %v1178_v24 }
 0x91e   :  { %1065 = vmatpush3.msra.mxu1 %v1238_v25 }
 0x91f   :  { %1066 = vmatprep.subr.mxu1 %v1178_v24 }
 0x920   :  { %1067 = vmatpush3.msra.mxu1 %v1245_v26 }
 0x921   :  { %1068 = vmatprep.subr.mxu1 %v1178_v24 }
 0x922   :  { %1069 = vmatpush3.msra.mxu1 %v1251_v27 }
 0x923   :  { %1084 = vmatprep.subr.mxu1 %v1178_v24 }
 0x9db   :  { %v454_v18 = vpop.f32.mrf.mxu1 }
 0x9dc   :  { %v455_v19 = vadd.f32 %v454_v18, %v1223_v8 }
 0x9dd   :  { %v1050_v20 = vpop.f32.mrf.mxu1 }
 0x9de   :  { %v459_v21 = vrot.slane %v455_v19, 2 }
 0x9e0   :  { %468 = vrot.lane.b32.xlu1 %v459_v21, %s1176_s1  ;;  %v461_v22 = vadd.f32 %v459_v21, %v1229_v13 }
 0x9e2   :  { %v966_v28 = vmul.f32 -1.442695, %v461_v22 }
 0x9e4   :  { %1121 = vpow2.f32 %v966_v28 }
 0x9f1   :  { %v1122_v29 = vpop.eup %1121 }
 0x9f2   :  { %v465_v30 = vadd.f32 1.0, %v1122_v29 }
 0x9f4   :  { %1123 = vrcp.f32 %v465_v30 }
 0xa01   :  { %v1124_v32 = vpop.eup %1123 }
 0xa52   :  { %v469_v33 = vpop.permute.xlu1 %468 }
 0xa53   :  { %v471_v34 = vmul.f32 %v1124_v32, %v469_v33 }
 0xa55   :  { %473 = vrot.lane.b32.xlu0 %v471_v34, %s1176_s1 }
 0xac7   :  { %v474_v35 = vpop.permute.xlu0 %473 }
 0xac8   :  { %v476_v36 = vadd.f32 %v474_v35, %v1229_v13 }
 0xaca   :  { %1125 = vtanh.f32 %v476_v36 }
 0xad7   :  { %v1126_v37 = vpop.eup %1125 }
 0xad8   :  { %v479_v38 = vrot.slane %v1126_v37, 2 }
 0xada   :  { %v481_v39 = vsub.f32 %v1312_v15, %v479_v38 }
 0xadc   :  { %v483_v40 = vrot.slane %v481_v39, 6 }
 0xade   :  { %484 = vrot.lane.b32.xlu1 %v483_v40, %s1177_s0 }
 0xb50   :  { %v485_v41 = vpop.permute.xlu1 %484 }
 0xb51   :  { %v487_v42 = vmul.f32 %v1124_v32, %v485_v41 }
 0xb53   :  { %489 = vrot.lane.b32.xlu0 %v487_v42, %s1180_s3 }
 0xbc5   :  { %v490_v43 = vpop.permute.xlu0 %489 }
 0xbc6   :  { %v1335_v44 = vadd.f32 %v1126_v37, %v490_v43 }
 0xbc8   :  { %v494_v45 = vrot.slane %v1335_v44, 6 }
 0xbca   :  { %495 = vrot.lane.b32.xlu1 %v494_v45, %s1176_s1 }
 0xc3c   :  { %v496_v13 = vpop.permute.xlu1 %495 }
 0xc3d   :  { %1060 = vmatmul.mubr.msk.f32.vlgmr.msra.gmra.mxu0 %vm163_vm3, %v496_v13 }
 0xc3e   :  { %1074 = vmatpush3.msra.mxu0 %v1235_v23  ;;  %1081 = vmatprep.mubr.msk.f32.mxu0 %vm1179_vm2, %v1178_v24 }
 0xc3f   :  { %1075 = vmatprep.subr.mxu0 %v1178_v24 }
 0xc40   :  { %1076 = vmatpush3.msra.mxu0 %v1238_v25 }
 0xc41   :  { %1077 = vmatprep.subr.mxu0 %v1178_v24 }
 0xc42   :  { %1078 = vmatpush3.msra.mxu0 %v1245_v26 }
 0xc43   :  { %1079 = vmatprep.subr.mxu0 %v1178_v24 }
 0xc44   :  { %1080 = vmatpush3.msra.mxu0 %v1251_v27 }
 0xcfd   :  { %v565_v46 = vpop.f32.mrf.mxu0 }
 0xcfe   :  { %v566_v47 = vadd.f32 %v565_v46, %v1223_v8 }
 0xcff   :  { %v1061_v48 = vpop.f32.mrf.mxu0 }
 0xd00   :  { %577 = vrot.lane.b32.xlu0 %v566_v47, %s1176_s1  ;;  %v569_v49 = vadd.f32 %v566_v47, %v1227_v11 }
 0xd02   :  { %v968_v50 = vmul.f32 -1.442695, %v569_v49 }
 0xd04   :  { %1127 = vpow2.f32 %v968_v50 }
 0xd11   :  { %v1128_v51 = vpop.eup %1127 }
 0xd12   :  { %v573_v52 = vadd.f32 1.0, %v1128_v51 }
 0xd14   :  { %1129 = vrcp.f32 %v573_v52 }
 0xd21   :  { %v1130_v54 = vpop.eup %1129 }
 0xd72   :  { %v578_v55 = vpop.permute.xlu0 %577 }
 0xd73   :  { %v580_v56 = vmul.f32 %v1130_v54, %v578_v55 }
 0xd75   :  { %582 = vrot.lane.b32.xlu1 %v580_v56, %s1176_s1 }
 0xde7   :  { %v583_v57 = vpop.permute.xlu1 %582 }
 0xde8   :  { %v585_v58 = vadd.f32 %v583_v57, %v1227_v11 }
 0xdea   :  { %1131 = vtanh.f32 %v585_v58 }
 0xdf7   :  { %v1132_v59 = vpop.eup %1131 }
 0xdf8   :  { %v588_v60 = vrot.slane %v1132_v59, 2 }
 0xdfa   :  { %v590_v61 = vsub.f32 %v1335_v44, %v588_v60 }
 0xdfc   :  { %v592_v62 = vrot.slane %v590_v61, 6 }
 0xdfe   :  { %593 = vrot.lane.b32.xlu0 %v592_v62, %s1177_s0 }
 0xe70   :  { %v594_v63 = vpop.permute.xlu0 %593 }
 0xe71   :  { %v596_v0 = vmul.f32 %v1130_v54, %v594_v63 }
 0xe73   :  { %598 = vrot.lane.b32.xlu1 %v596_v0, %s1180_s3 }
 0xee5   :  { %v599_v1 = vpop.permute.xlu1 %598 }
 0xee6   :  { %v1357_v2 = vadd.f32 %v1132_v59, %v599_v1 }
 0xee8   :  { %603 = vrot.lane.b32.xlu0 %v1357_v2, %s1176_s1 }
 0xf5a   :  { %v604_v3 = vpop.permute.xlu0 %603 }
 0xf5b   :  { %1071 = vmatmul.mubr.msk.f32.vlgmr.msra.gmra.mxu1 %vm163_vm3, %v604_v3 }
 0xf5c   :  { %1085 = vmatpush3.msra.mxu1 %v1235_v23  ;;  %1092 = vmatprep.mubr.msk.f32.mxu1 %vm1179_vm2, %v1178_v24 }
 0xf5d   :  { %1086 = vmatprep.subr.mxu1 %v1178_v24 }
 0xf5e   :  { %1087 = vmatpush3.msra.mxu1 %v1238_v25 }
 0xf5f   :  { %1088 = vmatprep.subr.mxu1 %v1178_v24 }
 0xf60   :  { %1089 = vmatpush3.msra.mxu1 %v1245_v26 }
 0xf61   :  { %1090 = vmatprep.subr.mxu1 %v1178_v24 }
 0xf62   :  { %1091 = vmatpush3.msra.mxu1 %v1251_v27 }
0x101b   :  { %v673_v4 = vpop.f32.mrf.mxu1 }
0x101c   :  { %v674_v5 = vadd.f32 %v673_v4, %v1223_v8 }
0x101d   :  { %v1072_v6 = vpop.f32.mrf.mxu1 }
0x101e   :  { %v678_v23 = vrot.slane %v674_v5, 6 }
0x1020   :  { %687 = vrot.lane.b32.xlu1 %v678_v23, %s1176_s1  ;;  %v680_v7 = vadd.f32 %v678_v23, %v1227_v11 }
0x1022   :  { %v970_v9 = vmul.f32 -1.442695, %v680_v7 }
0x1024   :  { %1133 = vpow2.f32 %v970_v9  ;;  %v935_v9 = vsel %vm934_vm4, %v1266_v31, %v1289_v53 }
0x1031   :  { %v1134_v25 = vpop.eup %1133 }
0x1032   :  { %v684_v10 = vadd.f32 1.0, %v1134_v25  ;;  %v936_v25 = vsel %vm50_vm0, %v935_v9, %v1312_v15 }
0x1034   :  { %1135 = vrcp.f32 %v684_v10  ;;  %v938_v10 = vsel %vm937_vm5, %v936_v25, %v1335_v44 }
0x1041   :  { %v1136_v12 = vpop.eup %1135 }
0x1092   :  { %v688_v26 = vpop.permute.xlu1 %687 }
0x1093   :  { %v690_v14 = vmul.f32 %v1136_v12, %v688_v26 }
0x1095   :  { %692 = vrot.lane.b32.xlu0 %v690_v14, %s1176_s1 }
0x1107   :  { %v693_v24 = vpop.permute.xlu0 %692 }
0x1108   :  { %v695_v27 = vadd.f32 %v693_v24, %v1227_v11 }
0x110a   :  { %1137 = vtanh.f32 %v695_v27 }
0x1117   :  { %v1138_v16 = vpop.eup %1137 }
0x1118   :  { %v698_v17 = vrot.slane %v1138_v16, 2 }
0x111a   :  { %v700_v18 = vsub.f32 %v1357_v2, %v698_v17 }
0x111c   :  { %v702_v19 = vrot.slane %v700_v18, 6 }
0x111e   :  { %703 = vrot.lane.b32.xlu1 %v702_v19, %s1177_s0 }
0x1190   :  { %v704_v20 = vpop.permute.xlu1 %703 }
0x1191   :  { %v706_v21 = vmul.f32 %v1136_v12, %v704_v20 }
0x1193   :  { %708 = vrot.lane.b32.xlu0 %v706_v21, %s1180_s3 }
0x1205   :  { %v709_v22 = vpop.permute.xlu0 %708 }
0x1206   :  { %v1379_v28 = vadd.f32 %v1138_v16, %v709_v22 }
0x1208   :  { %v713_v29 = vrot.slane %v1379_v28, 2  ;;  %v939_v31 = vsel %vm934_vm4, %v1357_v2, %v1379_v28 }
0x120a   :  { %714 = vrot.lane.b32.xlu1 %v713_v29, %s1176_s1 }
0x127c   :  { %v715_v30 = vpop.permute.xlu1 %714 }
0x127d   :  { %1082 = vmatmul.mubr.msk.f32.vlgmr.msra.gmra.mxu0 %vm163_vm3, %v715_v30 }
0x133d   :  { %v784_v32 = vpop.f32.mrf.mxu0 }
0x133e   :  { %v785_v33 = vadd.f32 %v784_v32, %v1223_v8 }
0x133f   :  { %v1083_v34 = vpop.f32.mrf.mxu0 }
0x1340   :  { %v789_v35 = vrot.slane %v785_v33, 4 }
0x1342   :  { %798 = vrot.lane.b32.xlu0 %v789_v35, %s1176_s1  ;;  %v791_v36 = vadd.f32 %v789_v35, %v1227_v11 }
0x1344   :  { %v972_v37 = vmul.f32 -1.442695, %v791_v36 }
0x1346   :  { %1139 = vpow2.f32 %v972_v37 }
0x1353   :  { %v1140_v38 = vpop.eup %1139 }
0x1354   :  { %v795_v39 = vadd.f32 1.0, %v1140_v38 }
0x1356   :  { %1141 = vrcp.f32 %v795_v39 }
0x1363   :  { %v1142_v40 = vpop.eup %1141 }
0x13b4   :  { %v799_v41 = vpop.permute.xlu0 %798 }
0x13b5   :  { %v801_v42 = vmul.f32 %v1142_v40, %v799_v41 }
0x13b7   :  { %803 = vrot.lane.b32.xlu1 %v801_v42, %s1176_s1 }
0x1429   :  { %v804_v43 = vpop.permute.xlu1 %803 }
0x142a   :  { %v806_v45 = vadd.f32 %v804_v43, %v1227_v11 }
0x142c   :  { %1143 = vtanh.f32 %v806_v45 }
0x1439   :  { %v1144_v13 = vpop.eup %1143 }
0x143a   :  { %v809_v46 = vrot.slane %v1144_v13, 2 }
0x143c   :  { %v811_v47 = vsub.f32 %v1379_v28, %v809_v46 }
0x143e   :  { %v813_v48 = vrot.slane %v811_v47, 6 }
0x1440   :  { %814 = vrot.lane.b32.xlu0 %v813_v48, %s1177_s0 }
0x14b2   :  { %v815_v49 = vpop.permute.xlu0 %814 }
0x14b3   :  { %v817_v50 = vmul.f32 %v1142_v40, %v815_v49 }
0x14b5   :  { %819 = vrot.lane.b32.xlu1 %v817_v50, %s1180_s3 }
0x1527   :  { %v820_v51 = vpop.permute.xlu1 %819 }
0x1528   :  { %v822_v52 = vadd.f32 %v1144_v13, %v820_v51 }
0x152a   :  { %v824_v54 = vrot.slane %v822_v52, 4  ;;  %v940_v15 = vsel %vm50_vm0, %v939_v31, %v822_v52 }
0x152c   :  { %825 = vrot.lane.b32.xlu0 %v824_v54, %s1176_s1 }
0x159e   :  { %v826_v55 = vpop.permute.xlu0 %825 }
0x159f   :  { %1093 = vmatmul.mubr.msk.f32.vlgmr.msra.gmra.mxu1 %vm163_vm3, %v826_v55 }
0x165f   :  { %v895_v56 = vpop.f32.mrf.mxu1 }
0x1660   :  { %v896_v57 = vadd.f32 %v895_v56, %v1223_v8 }
0x1661   :  { %v1094_v58 = vpop.f32.mrf.mxu1 }
0x1662   :  { %v900_v59 = vrot.slane %v896_v57, 2 }
0x1664   :  { %909 = vrot.lane.b32.xlu1 %v900_v59, %s1176_s1  ;;  %v902_v60 = vadd.f32 %v900_v59, %v1227_v11 }
0x1666   :  { %v974_v61 = vmul.f32 -1.442695, %v902_v60 }
0x1668   :  { %1145 = vpow2.f32 %v974_v61 }
0x1675   :  { %v1146_v62 = vpop.eup %1145 }
0x1676   :  { %v906_v63 = vadd.f32 1.0, %v1146_v62 }
0x1678   :  { %1147 = vrcp.f32 %v906_v63 }
0x1685   :  { %v1148_v0 = vpop.eup %1147 }
0x16d6   :  { %v910_v1 = vpop.permute.xlu1 %909 }
0x16d7   :  { %v912_v3 = vmul.f32 %v1148_v0, %v910_v1 }
0x16d9   :  { %914 = vrot.lane.b32.xlu0 %v912_v3, %s1176_s1 }
0x174b   :  { %v915_v4 = vpop.permute.xlu0 %914 }
0x174c   :  { %v917_v5 = vadd.f32 %v915_v4, %v1227_v11 }
0x174e   :  { %1149 = vtanh.f32 %v917_v5 }
0x175b   :  { %v1150_v8 = vpop.eup %1149 }
0x175c   :  { %v920_v6 = vrot.slane %v1150_v8, 2 }
0x175e   :  { %v922_v23 = vsub.f32 %v822_v52, %v920_v6 }
0x1760   :  { %v924_v7 = vrot.slane %v922_v23, 6 }
0x1762   :  { %925 = vrot.lane.b32.xlu1 %v924_v7, %s1177_s0 }
0x1766   :  { %944 = vrot.lane.b32.xlu1 %v938_v10, %s1176_s1 }
0x17d4   :  { %v926_v11 = vpop.permute.xlu1 %925 }
0x17d5   :  { %v928_v12 = vmul.f32 %v1148_v0, %v926_v11 }
0x17d7   :  { %930 = vrot.lane.b32.xlu0 %v928_v12, %s1180_s3 }
0x17d8   :  { %v945_v26 = vpop.permute.xlu1 %944 }
0x17d9   :  { %950 = vst.msk [vmem:[%s1423_s4] sm:$0xff] %vm163_vm3, %v945_v26 }
0x1849   :  { %v931_v14 = vpop.permute.xlu0 %930 }
0x184a   :  { %v933_v53 = vadd.f32 %v1150_v8, %v931_v14 }
0x184c   :  { %v941_v44 = vsel %vm937_vm5, %v940_v15, %v933_v53 }
0x184d   :  { %946 = vrot.lane.b32.xlu0 %v941_v44, %s1176_s1 }
0x18bf   :  { %v947_v24 = vpop.permute.xlu0 %946 }
0x18c0   :  { %951 = vst.msk [vmem:[%s1423_s4 + $0x8] sm:$0xff] %vm163_vm3, %v947_v24 }
0x18c1   :  { %956 = vsyncpa [#allocation3], 1 }

</bundles_post_ra>
